<compile_context>
chip_gen: v6e
topology: v6e:2x2x1
jax: 0.10.0
libtpu: 0.0.40
codegen_flags: <defaults>
</compile_context>

<pallas_src>
import math
import numpy as np
import jax
import jax.numpy as jnp
from jax import lax
from jax.experimental import pallas as pl
from jax.experimental.pallas import tpu as pltpu

EPS = 1e-5                      # nn.LayerNorm default
VMEM_LIMIT = 64 * 1024 * 1024   # bytes


# --------------------------------------------------------------------------------------
# Kernel 1: LayerNorm(query) + Q/K/V projections (grid over batch, bf16 MXU operands)
# --------------------------------------------------------------------------------------
def _make_ln_qkv_kernel(has_qkv_bias):
    def kernel(q_ref, k_ref, v_ref, wq_ref, wk_ref, wv_ref, *rest):
        if has_qkv_bias:
            bq_ref, bk_ref, bv_ref, *rest = rest
        else:
            bq_ref = bk_ref = bv_ref = None
        g_ref, b_ref, qn_ref, qp_ref, kp_ref, vp_ref = rest

        cd = wq_ref.dtype                                   # compute (MXU-operand) dtype

        # LayerNorm in f32; the normalized query is the residual source -> keep f32.
        x = q_ref[0]                                        # (Sq, E) f32
        mu = jnp.mean(x, axis=-1, keepdims=True)
        var = jnp.mean(jnp.square(x - mu), axis=-1, keepdims=True)
        nx = (x - mu) * lax.rsqrt(var + EPS) * g_ref[...] + b_ref[...]
        qn_ref[0] = nx.astype(qn_ref.dtype)

        def proj(x_cd, w_ref, bias_ref, o_ref):
            acc = jnp.dot(x_cd, w_ref[...], preferred_element_type=jnp.float32)
            if bias_ref is not None:
                acc = acc + bias_ref[...]
            o_ref[0] = acc.astype(o_ref.dtype)              # bf16 interstage = stage-2 operand

        proj(nx.astype(cd), wq_ref, bq_ref, qp_ref)
        proj(k_ref[0].astype(cd), wk_ref, bk_ref, kp_ref)
        proj(v_ref[0].astype(cd), wv_ref, bv_ref, vp_ref)

    return kernel


# --------------------------------------------------------------------------------------
# Kernel 2: fused attention core (scores -> mask -> softmax -> ctx -> out-proj -> residual)
# --------------------------------------------------------------------------------------
def cross_attn_kernel(qlen_ref, klen_ref,                   # scalar-prefetch (SMEM)
                      qh_ref, kh_ref, vh_ref, qn_ref, wp_ref, bp_ref,
                      out_ref, attn_ref):
    b = pl.program_id(0)
    q = qh_ref[0]                                           # (H, Sq, Dh) compute dtype
    k = kh_ref[0]                                           # (H, Sk, Dh)
    v = vh_ref[0]                                           # (H, Sk, Dh)
    H, Sq, Dh = q.shape
    Sk = k.shape[1]
    E = out_ref.shape[-1]
    cd = q.dtype

    scale = 1.0 / math.sqrt(Dh)
    scores = jnp.einsum('hqd,hkd->hqk', q, k,
                        preferred_element_type=jnp.float32) * scale      # (H, Sq, Sk) f32

    # key-length mask (tiny (1,1,Sk) iota, broadcast over H and Sq). Matches masked_fill(-inf);
    # NOTE: key_lengths[b] == 0 would make a whole row -inf -> NaN, same as the torch module.
    kpos = lax.broadcasted_iota(jnp.int32, (1, 1, Sk), 2)
    scores = jnp.where(kpos >= klen_ref[b], -jnp.inf, scores)

    # numerically-stable softmax over Sk, one reciprocal per (h, q) row (EUP)
    m = jnp.max(scores, axis=-1, keepdims=True)
    e = jnp.exp(scores - m)
    attn = e * pl.reciprocal(jnp.sum(e, axis=-1, keepdims=True), approx=True)
    attn_ref[0] = attn.astype(attn_ref.dtype)               # dropout(eval) = identity

    # attention context then out-projection, accumulated head-by-head into f32 (Sq, E)
    ctx = jnp.einsum('hqk,hkd->hqd', attn.astype(cd), v,
                     preferred_element_type=jnp.float32)    # (H, Sq, Dh) f32
    out = jnp.zeros((Sq, E), jnp.float32)
    for h in range(H):                                      # static unroll; no (H,Sq,E) live value
        out = out + jnp.dot(ctx[h].astype(cd), wp_ref[h],
                            preferred_element_type=jnp.float32)
    out = out + bp_ref[...]

    # query-length mask on the projected output; dropout(eval)=id; residual with normed query
    qpos = lax.broadcasted_iota(jnp.int32, (Sq, 1), 0)
    out = jnp.where(qpos < qlen_ref[b], out, 0.0)
    out_ref[0] = (out + qn_ref[0]).astype(out_ref.dtype)


# --------------------------------------------------------------------------------------
# Wrapper
# --------------------------------------------------------------------------------------
def decoder_cross_attention(query, key, value, params, num_heads,
                            query_lengths=None, key_lengths=None,
                            qkv_biases=None,
                            compute_dtype=jnp.bfloat16,
                            attn_dtype=jnp.float32):
    wq, wk, wv, wp, bp, gamma, beta = params
    B, Sq, E = query.shape
    _, Sk, _ = key.shape
    D = wq.shape[1]
    H = num_heads
    Dh = D // H
    f32 = jnp.float32
    has_qkv_bias = qkv_biases is not None

    if query_lengths is None:
        query_lengths = jnp.full((B,), Sq, dtype=jnp.int32)
    if key_lengths is None:
        key_lengths = jnp.full((B,), Sk, dtype=jnp.int32)
    query_lengths = query_lengths.astype(jnp.int32)
    key_lengths = key_lengths.astype(jnp.int32)

    query = query.astype(f32)
    key = key.astype(f32)
    value = value.astype(f32)

    # MXU operands in compute_dtype (bf16 by default); LN affine / out-proj bias stay f32.
    wq_c = wq.astype(compute_dtype)
    wk_c = wk.astype(compute_dtype)
    wv_c = wv.astype(compute_dtype)
    wp_c = wp.reshape(H, Dh, E).astype(compute_dtype)       # out_proj weight per head
    gamma = gamma.astype(f32)
    beta = beta.astype(f32)
    bp = bp.astype(f32)

    cparams = pltpu.CompilerParams(dimension_semantics=("parallel",),
                                   vmem_limit_bytes=VMEM_LIMIT)
    inv2 = lambda s: pl.BlockSpec(s, lambda b: (0, 0))      # grid-invariant 2-D block

    # ---- kernel 1: LN + Q/K/V projections ----
    k1_in_specs = [
        pl.BlockSpec((1, Sq, E), lambda b: (b, 0, 0)),      # query
        pl.BlockSpec((1, Sk, E), lambda b: (b, 0, 0)),      # key
        pl.BlockSpec((1, Sk, E), lambda b: (b, 0, 0)),      # value
        inv2((E, D)), inv2((E, D)), inv2((E, D)),           # Wq, Wk, Wv
    ]
    k1_args = [query, key, value, wq_c, wk_c, wv_c]
    if has_qkv_bias:
        bq, bk, bv = (x.astype(f32) for x in qkv_biases)
        k1_in_specs += [inv2((1, D)), inv2((1, D)), inv2((1, D))]
        k1_args += [bq, bk, bv]
    k1_in_specs += [inv2((1, E)), inv2((1, E))]             # LN gamma, beta
    k1_args += [gamma, beta]

    qn, qp, kp, vp = pl.pallas_call(
        _make_ln_qkv_kernel(has_qkv_bias),
        out_shape=(jax.ShapeDtypeStruct((B, Sq, E), f32),
                   jax.ShapeDtypeStruct((B, Sq, D), compute_dtype),
                   jax.ShapeDtypeStruct((B, Sk, D), compute_dtype),
                   jax.ShapeDtypeStruct((B, Sk, D), compute_dtype)),
        grid_spec=pltpu.PrefetchScalarGridSpec(
            num_scalar_prefetch=0,
            grid=(B,),
            in_specs=k1_in_specs,
            out_specs=[
                pl.BlockSpec((1, Sq, E), lambda b: (b, 0, 0)),
                pl.BlockSpec((1, Sq, D), lambda b: (b, 0, 0)),
                pl.BlockSpec((1, Sk, D), lambda b: (b, 0, 0)),
                pl.BlockSpec((1, Sk, D), lambda b: (b, 0, 0)),
            ]),
        compiler_params=cparams,
    )(*k1_args)

    # torch `.view(B, H, S, Dh)`: row-major reinterpretation of the flat buffer (layout only,
    # no transpose) — a free XLA reshape on the bf16 interstage tensors.
    qh = qp.reshape(B, H, Sq, Dh)
    kh = kp.reshape(B, H, Sk, Dh)
    vh = vp.reshape(B, H, Sk, Dh)

    # ---- kernel 2: fused attention core ----
    out_skip, attn_weights = pl.pallas_call(
        cross_attn_kernel,
        out_shape=(jax.ShapeDtypeStruct((B, Sq, E), f32),
                   jax.ShapeDtypeStruct((B, H, Sq, Sk), attn_dtype)),
        grid_spec=pltpu.PrefetchScalarGridSpec(
            num_scalar_prefetch=2,                          # query_lengths, key_lengths (SMEM)
            grid=(B,),
            in_specs=[
                pl.BlockSpec((1, H, Sq, Dh), lambda b, *_: (b, 0, 0, 0)),  # Q heads
                pl.BlockSpec((1, H, Sk, Dh), lambda b, *_: (b, 0, 0, 0)),  # K heads
                pl.BlockSpec((1, H, Sk, Dh), lambda b, *_: (b, 0, 0, 0)),  # V heads
                pl.BlockSpec((1, Sq, E),     lambda b, *_: (b, 0, 0)),     # normed query (f32)
                pl.BlockSpec((H, Dh, E),     lambda b, *_: (0, 0, 0)),     # out_proj W per head
                pl.BlockSpec((1, E),         lambda b, *_: (0, 0)),        # out_proj bias
            ],
            out_specs=[
                pl.BlockSpec((1, Sq, E),     lambda b, *_: (b, 0, 0)),
                pl.BlockSpec((1, H, Sq, Sk), lambda b, *_: (b, 0, 0, 0)),
            ]),
        compiler_params=cparams,
    )(query_lengths, key_lengths, qh, kh, vh, qn, wp_c, bp)

    return out_skip, attn_weights


# --------------------------------------------------------------------------------------
# Pure-JAX reference (mirrors the PyTorch forward, eval-mode dropout, qkv_bias=False)
# --------------------------------------------------------------------------------------
def cross_attention_ref(query, key, value, params, num_heads, query_lengths, key_lengths):
    wq, wk, wv, wp, bp, gamma, beta = params
    B, Sq, E = query.shape
    _, Sk, _ = key.shape
    D = wq.shape[1]
    Dh = D // num_heads

    mu = jnp.mean(query, -1, keepdims=True)
    var = jnp.mean(jnp.square(query - mu), -1, keepdims=True)
    qn = (query - mu) * lax.rsqrt(var + EPS) * gamma + beta

    q2 = qn @ wq
    k2 = key @ wk
    v2 = value @ wv
    qh = q2.reshape(B, num_heads, Sq, Dh)       # torch .view (no transpose)
    kh = k2.reshape(B, num_heads, Sk, Dh)
    vh = v2.reshape(B, num_heads, Sk, Dh)

    scores = jnp.einsum('bhqd,bhkd->bhqk', qh, kh) / math.sqrt(Dh)
    kv_mask = jnp.arange(Sk)[None, :] >= key_lengths[:, None]
    scores = jnp.where(kv_mask[:, None, None, :], -jnp.inf, scores)

    m = jnp.max(scores, -1, keepdims=True)
    e = jnp.exp(scores - m)
    attn = e / jnp.sum(e, -1, keepdims=True)

    ctx = jnp.einsum('bhqk,bhkd->bhqd', attn, vh)
    merged = jnp.transpose(ctx, (0, 2, 1, 3)).reshape(B, Sq, D)
    out = merged @ wp + bp
    q_mask = (jnp.arange(Sq)[None, :] < query_lengths[:, None]).astype(out.dtype)
    out = out * q_mask[:, :, None]
    return out + qn, attn


# --------------------------------------------------------------------------------------
# Parameters (nn.Linear-style init; weights stored as (in, out) for x @ W; qkv_bias=False)
# --------------------------------------------------------------------------------------
def init_params(key, embed_size, d_out_n_heads):
    k1, k2, k3, k4, k5 = jax.random.split(key, 5)
    limE = 1.0 / math.sqrt(embed_size)
    limD = 1.0 / math.sqrt(d_out_n_heads)
    wq = jax.random.uniform(k1, (embed_size, d_out_n_heads), jnp.float32, -limE, limE)
    wk = jax.random.uniform(k2, (embed_size, d_out_n_heads), jnp.float32, -limE, limE)
    wv = jax.random.uniform(k3, (embed_size, d_out_n_heads), jnp.float32, -limE, limE)
    wp = jax.random.uniform(k4, (d_out_n_heads, embed_size), jnp.float32, -limD, limD)
    bp = jax.random.uniform(k5, (1, embed_size), jnp.float32, -limD, limD)
    gamma = jnp.ones((1, embed_size), jnp.float32)
    beta = jnp.zeros((1, embed_size), jnp.float32)
    return (wq, wk, wv, wp, bp, gamma, beta)


if __name__ == "__main__":
    batch, seq_len_q, seq_len_k = 2, 8, 16
    embed_size, d_out_n_heads, num_heads = 32, 32, 4

    root = jax.random.PRNGKey(0)
    kq, kk, kv, kpar = jax.random.split(root, 4)
    query = jax.random.normal(kq, (batch, seq_len_q, embed_size), jnp.float32)
    key_in = jax.random.normal(kk, (batch, seq_len_k, embed_size), jnp.float32)
    value_in = jax.random.normal(kv, (batch, seq_len_k, embed_size), jnp.float32)
    query_lengths = jnp.array([8, 6], jnp.int32)
    key_lengths = jnp.array([16, 9], jnp.int32)
    params = init_params(kpar, embed_size, d_out_n_heads)

    ref_out, ref_attn = cross_attention_ref(
        query, key_in, value_in, params, num_heads, query_lengths, key_lengths)

    # Production path: bf16 MXU operands / interstage tensors, bf16 attention-weights output.
    out_bf, attn_bf = decoder_cross_attention(
        query, key_in, value_in, params, num_heads,
        query_lengths=query_lengths, key_lengths=key_lengths,
        compute_dtype=jnp.bfloat16, attn_dtype=jnp.bfloat16)
    jax.block_until_ready((out_bf, attn_bf))
    assert out_bf.shape == (batch, seq_len_q, embed_size)
    assert attn_bf.shape == (batch, num_heads, seq_len_q, seq_len_k)
    np.testing.assert_allclose(np.asarray(out_bf), np.asarray(ref_out),
                               atol=4e-2, rtol=4e-2)
    np.testing.assert_allclose(np.asarray(attn_bf.astype(jnp.float32)),
                               np.asarray(ref_attn), atol=4e-2, rtol=4e-2)

    # f32 parity path: same kernels with f32 operands, tight tolerance vs the reference.
    out_f32, attn_f32 = decoder_cross_attention(
        query, key_in, value_in, params, num_heads,
        query_lengths=query_lengths, key_lengths=key_lengths,
        compute_dtype=jnp.float32, attn_dtype=jnp.float32)
    jax.block_until_ready((out_f32, attn_f32))
    np.testing.assert_allclose(np.asarray(out_f32), np.asarray(ref_out),
                               atol=1e-3, rtol=1e-3)
    np.testing.assert_allclose(np.asarray(attn_f32), np.asarray(ref_attn),
                               atol=1e-3, rtol=1e-3)

    print("KERNEL_OK")
</pallas_src>

<mosaic_0001>
module attributes {stable_mosaic.version = 11 : i64} {
  func.func @kernel(%arg0: i32, %arg1: memref<1x8x32xf32, #tpu.memory_space<vmem>>, %arg2: memref<1x16x32xf32, #tpu.memory_space<vmem>>, %arg3: memref<1x16x32xf32, #tpu.memory_space<vmem>>, %arg4: memref<32x32xbf16, #tpu.memory_space<vmem>>, %arg5: memref<32x32xbf16, #tpu.memory_space<vmem>>, %arg6: memref<32x32xbf16, #tpu.memory_space<vmem>>, %arg7: memref<1x32xf32, #tpu.memory_space<vmem>>, %arg8: memref<1x32xf32, #tpu.memory_space<vmem>>, %arg9: memref<1x8x32xf32, #tpu.memory_space<vmem>>, %arg10: memref<1x8x32xbf16, #tpu.memory_space<vmem>>, %arg11: memref<1x16x32xbf16, #tpu.memory_space<vmem>>, %arg12: memref<1x16x32xbf16, #tpu.memory_space<vmem>>) attributes {dimension_semantics = [#tpu.dimension_semantics<parallel>], iteration_bounds = array<i64: 2>, scalar_prefetch = 0 : i64, scratch_operands = 0 : i64, tpu.core_type = #tpu.core_type<tc>, window_params = [{transform_indices = @transform_0, window_bounds = array<i64: 1, 8, 32>}, {transform_indices = @transform_1, window_bounds = array<i64: 1, 16, 32>}, {transform_indices = @transform_2, window_bounds = array<i64: 1, 16, 32>}, {pipeline_mode = #tpu.pipeline_mode<synchronous>, transform_indices = @transform_3, window_bounds = array<i64: 32, 32>}, {pipeline_mode = #tpu.pipeline_mode<synchronous>, transform_indices = @transform_4, window_bounds = array<i64: 32, 32>}, {pipeline_mode = #tpu.pipeline_mode<synchronous>, transform_indices = @transform_5, window_bounds = array<i64: 32, 32>}, {pipeline_mode = #tpu.pipeline_mode<synchronous>, transform_indices = @transform_6, window_bounds = array<i64: 1, 32>}, {pipeline_mode = #tpu.pipeline_mode<synchronous>, transform_indices = @transform_7, window_bounds = array<i64: 1, 32>}, {transform_indices = @transform_8, window_bounds = array<i64: 1, 8, 32>}, {transform_indices = @transform_9, window_bounds = array<i64: 1, 8, 32>}, {transform_indices = @transform_10, window_bounds = array<i64: 1, 16, 32>}, {transform_indices = @transform_11, window_bounds = array<i64: 1, 16, 32>}]} {
    %c0 = arith.constant 0 : index
    %c0_0 = arith.constant 0 : index
    %c0_1 = arith.constant 0 : index
    %0 = vector.load %arg1[%c0, %c0_0, %c0_1] : memref<1x8x32xf32, #tpu.memory_space<vmem>>, vector<1x8x32xf32>
    %1 = vector.shape_cast %0 : vector<1x8x32xf32> to vector<8x32xf32>
    %cst = arith.constant dense<0.000000e+00> : vector<8xf32>
    %2 = vector.multi_reduction <add>, %1, %cst [1] : vector<8x32xf32> to vector<8xf32>
    %3 = vector.shape_cast %2 : vector<8xf32> to vector<8x1xf32>
    %cst_2 = arith.constant 3.200000e+01 : f32
    %4 = vector.broadcast %cst_2 : f32 to vector<8x1xf32>
    %5 = arith.divf %3, %4 : vector<8x1xf32>
    %6 = vector.broadcast %5 : vector<8x1xf32> to vector<8x32xf32>
    %7 = arith.subf %1, %6 : vector<8x32xf32>
    %8 = arith.mulf %7, %7 : vector<8x32xf32>
    %cst_3 = arith.constant dense<0.000000e+00> : vector<8xf32>
    %9 = vector.multi_reduction <add>, %8, %cst_3 [1] : vector<8x32xf32> to vector<8xf32>
    %10 = vector.shape_cast %9 : vector<8xf32> to vector<8x1xf32>
    %cst_4 = arith.constant 3.200000e+01 : f32
    %11 = vector.broadcast %cst_4 : f32 to vector<8x1xf32>
    %12 = arith.divf %10, %11 : vector<8x1xf32>
    %13 = vector.broadcast %5 : vector<8x1xf32> to vector<8x32xf32>
    %14 = arith.subf %1, %13 : vector<8x32xf32>
    %cst_5 = arith.constant 9.99999974E-6 : f32
    %15 = vector.broadcast %cst_5 : f32 to vector<8x1xf32>
    %16 = arith.addf %12, %15 : vector<8x1xf32>
    %17 = math.rsqrt %16 : vector<8x1xf32>
    %18 = vector.broadcast %17 : vector<8x1xf32> to vector<8x32xf32>
    %19 = arith.mulf %14, %18 : vector<8x32xf32>
    %c0_6 = arith.constant 0 : index
    %c0_7 = arith.constant 0 : index
    %20 = vector.load %arg7[%c0_6, %c0_7] : memref<1x32xf32, #tpu.memory_space<vmem>>, vector<1x32xf32>
    %21 = vector.broadcast %20 : vector<1x32xf32> to vector<8x32xf32>
    %22 = arith.mulf %19, %21 : vector<8x32xf32>
    %c0_8 = arith.constant 0 : index
    %c0_9 = arith.constant 0 : index
    %23 = vector.load %arg8[%c0_8, %c0_9] : memref<1x32xf32, #tpu.memory_space<vmem>>, vector<1x32xf32>
    %24 = vector.broadcast %23 : vector<1x32xf32> to vector<8x32xf32>
    %25 = arith.addf %22, %24 : vector<8x32xf32>
    %c0_10 = arith.constant 0 : index
    %c0_11 = arith.constant 0 : index
    %c0_12 = arith.constant 0 : index
    %26 = vector.load %arg9[%c0_10, %c0_11, %c0_12] : memref<1x8x32xf32, #tpu.memory_space<vmem>>, vector<1x8x32xf32>
    %27 = vector.shape_cast %26 : vector<1x8x32xf32> to vector<8x32xf32>
    %28 = vector.shape_cast %25 : vector<8x32xf32> to vector<1x8x32xf32>
    tpu.vector_store %arg9[%c0_10, %c0_11, %c0_12], %28 {strides = array<i32>} : memref<1x8x32xf32, #tpu.memory_space<vmem>>, vector<1x8x32xf32>,
    %29 = arith.truncf %25 : vector<8x32xf32> to vector<8x32xbf16>
    %c0_13 = arith.constant 0 : index
    %c0_14 = arith.constant 0 : index
    %30 = vector.load %arg4[%c0_13, %c0_14] : memref<32x32xbf16, #tpu.memory_space<vmem>>, vector<32x32xbf16>
    %cst_15 = arith.constant dense<0.000000e+00> : vector<8x32xf32>
    %31 = tpu.matmul %29, %30, %cst_15 {dimension_numbers = #tpu.dot_dimension_numbers<[1], [0], [0], [1], [0, 0, 1, 1], [], []>} : vector<8x32xbf16>, vector<32x32xbf16>, vector<8x32xf32> -> vector<8x32xf32>
    %32 = arith.truncf %31 : vector<8x32xf32> to vector<8x32xbf16>
    %c0_16 = arith.constant 0 : index
    %c0_17 = arith.constant 0 : index
    %c0_18 = arith.constant 0 : index
    %33 = vector.load %arg10[%c0_16, %c0_17, %c0_18] : memref<1x8x32xbf16, #tpu.memory_space<vmem>>, vector<1x8x32xbf16>
    %34 = vector.shape_cast %33 : vector<1x8x32xbf16> to vector<8x32xbf16>
    %35 = vector.shape_cast %32 : vector<8x32xbf16> to vector<1x8x32xbf16>
    tpu.vector_store %arg10[%c0_16, %c0_17, %c0_18], %35 {strides = array<i32>} : memref<1x8x32xbf16, #tpu.memory_space<vmem>>, vector<1x8x32xbf16>,
    %c0_19 = arith.constant 0 : index
    %c0_20 = arith.constant 0 : index
    %c0_21 = arith.constant 0 : index
    %36 = vector.load %arg2[%c0_19, %c0_20, %c0_21] : memref<1x16x32xf32, #tpu.memory_space<vmem>>, vector<1x16x32xf32>
    %37 = vector.shape_cast %36 : vector<1x16x32xf32> to vector<16x32xf32>
    %38 = arith.truncf %37 : vector<16x32xf32> to vector<16x32xbf16>
    %c0_22 = arith.constant 0 : index
    %c0_23 = arith.constant 0 : index
    %39 = vector.load %arg5[%c0_22, %c0_23] : memref<32x32xbf16, #tpu.memory_space<vmem>>, vector<32x32xbf16>
    %cst_24 = arith.constant dense<0.000000e+00> : vector<16x32xf32>
    %40 = tpu.matmul %38, %39, %cst_24 {dimension_numbers = #tpu.dot_dimension_numbers<[1], [0], [0], [1], [0, 0, 1, 1], [], []>} : vector<16x32xbf16>, vector<32x32xbf16>, vector<16x32xf32> -> vector<16x32xf32>
    %41 = arith.truncf %40 : vector<16x32xf32> to vector<16x32xbf16>
    %c0_25 = arith.constant 0 : index
    %c0_26 = arith.constant 0 : index
    %c0_27 = arith.constant 0 : index
    %42 = vector.load %arg11[%c0_25, %c0_26, %c0_27] : memref<1x16x32xbf16, #tpu.memory_space<vmem>>, vector<1x16x32xbf16>
    %43 = vector.shape_cast %42 : vector<1x16x32xbf16> to vector<16x32xbf16>
    %44 = vector.shape_cast %41 : vector<16x32xbf16> to vector<1x16x32xbf16>
    tpu.vector_store %arg11[%c0_25, %c0_26, %c0_27], %44 {strides = array<i32>} : memref<1x16x32xbf16, #tpu.memory_space<vmem>>, vector<1x16x32xbf16>,
    %c0_28 = arith.constant 0 : index
    %c0_29 = arith.constant 0 : index
    %c0_30 = arith.constant 0 : index
    %45 = vector.load %arg3[%c0_28, %c0_29, %c0_30] : memref<1x16x32xf32, #tpu.memory_space<vmem>>, vector<1x16x32xf32>
    %46 = vector.shape_cast %45 : vector<1x16x32xf32> to vector<16x32xf32>
    %47 = arith.truncf %46 : vector<16x32xf32> to vector<16x32xbf16>
    %c0_31 = arith.constant 0 : index
    %c0_32 = arith.constant 0 : index
    %48 = vector.load %arg6[%c0_31, %c0_32] : memref<32x32xbf16, #tpu.memory_space<vmem>>, vector<32x32xbf16>
    %cst_33 = arith.constant dense<0.000000e+00> : vector<16x32xf32>
    %49 = tpu.matmul %47, %48, %cst_33 {dimension_numbers = #tpu.dot_dimension_numbers<[1], [0], [0], [1], [0, 0, 1, 1], [], []>} : vector<16x32xbf16>, vector<32x32xbf16>, vector<16x32xf32> -> vector<16x32xf32>
    %50 = arith.truncf %49 : vector<16x32xf32> to vector<16x32xbf16>
    %c0_34 = arith.constant 0 : index
    %c0_35 = arith.constant 0 : index
    %c0_36 = arith.constant 0 : index
    %51 = vector.load %arg12[%c0_34, %c0_35, %c0_36] : memref<1x16x32xbf16, #tpu.memory_space<vmem>>, vector<1x16x32xbf16>
    %52 = vector.shape_cast %51 : vector<1x16x32xbf16> to vector<16x32xbf16>
    %53 = vector.shape_cast %50 : vector<16x32xbf16> to vector<1x16x32xbf16>
    tpu.vector_store %arg12[%c0_34, %c0_35, %c0_36], %53 {strides = array<i32>} : memref<1x16x32xbf16, #tpu.memory_space<vmem>>, vector<1x16x32xbf16>,
    return
  }
  func.func @transform_0(%arg0: i32) -> (i32, i32, i32) {
    %c0_i32 = arith.constant 0 : i32
    %c0_i32_0 = arith.constant 0 : i32
    %c0_i32_1 = arith.constant 0 : i32
    return %arg0, %c0_i32, %c0_i32_0 : i32, i32, i32
  }
  func.func @transform_1(%arg0: i32) -> (i32, i32, i32) {
    %c0_i32 = arith.constant 0 : i32
    %c0_i32_0 = arith.constant 0 : i32
    %c0_i32_1 = arith.constant 0 : i32
    return %arg0, %c0_i32, %c0_i32_0 : i32, i32, i32
  }
  func.func @transform_2(%arg0: i32) -> (i32, i32, i32) {
    %c0_i32 = arith.constant 0 : i32
    %c0_i32_0 = arith.constant 0 : i32
    %c0_i32_1 = arith.constant 0 : i32
    return %arg0, %c0_i32, %c0_i32_0 : i32, i32, i32
  }
  func.func @transform_3(%arg0: i32) -> (i32, i32) {
    %c0_i32 = arith.constant 0 : i32
    %c0_i32_0 = arith.constant 0 : i32
    %c0_i32_1 = arith.constant 0 : i32
    return %c0_i32, %c0_i32_0 : i32, i32
  }
  func.func @transform_4(%arg0: i32) -> (i32, i32) {
    %c0_i32 = arith.constant 0 : i32
    %c0_i32_0 = arith.constant 0 : i32
    %c0_i32_1 = arith.constant 0 : i32
    return %c0_i32, %c0_i32_0 : i32, i32
  }
  func.func @transform_5(%arg0: i32) -> (i32, i32) {
    %c0_i32 = arith.constant 0 : i32
    %c0_i32_0 = arith.constant 0 : i32
    %c0_i32_1 = arith.constant 0 : i32
    return %c0_i32, %c0_i32_0 : i32, i32
  }
  func.func @transform_6(%arg0: i32) -> (i32, i32) {
    %c0_i32 = arith.constant 0 : i32
    %c0_i32_0 = arith.constant 0 : i32
    %c0_i32_1 = arith.constant 0 : i32
    return %c0_i32, %c0_i32_0 : i32, i32
  }
  func.func @transform_7(%arg0: i32) -> (i32, i32) {
    %c0_i32 = arith.constant 0 : i32
    %c0_i32_0 = arith.constant 0 : i32
    %c0_i32_1 = arith.constant 0 : i32
    return %c0_i32, %c0_i32_0 : i32, i32
  }
  func.func @transform_8(%arg0: i32) -> (i32, i32, i32) {
    %c0_i32 = arith.constant 0 : i32
    %c0_i32_0 = arith.constant 0 : i32
    %c0_i32_1 = arith.constant 0 : i32
    return %arg0, %c0_i32, %c0_i32_0 : i32, i32, i32
  }
  func.func @transform_9(%arg0: i32) -> (i32, i32, i32) {
    %c0_i32 = arith.constant 0 : i32
    %c0_i32_0 = arith.constant 0 : i32
    %c0_i32_1 = arith.constant 0 : i32
    return %arg0, %c0_i32, %c0_i32_0 : i32, i32, i32
  }
  func.func @transform_10(%arg0: i32) -> (i32, i32, i32) {
    %c0_i32 = arith.constant 0 : i32
    %c0_i32_0 = arith.constant 0 : i32
    %c0_i32_1 = arith.constant 0 : i32
    return %arg0, %c0_i32, %c0_i32_0 : i32, i32, i32
  }
  func.func @transform_11(%arg0: i32) -> (i32, i32, i32) {
    %c0_i32 = arith.constant 0 : i32
    %c0_i32_0 = arith.constant 0 : i32
    %c0_i32_1 = arith.constant 0 : i32
    return %arg0, %c0_i32, %c0_i32_0 : i32, i32, i32
  }
}

</mosaic_0001>

<bundles_post_ra>
// kernel: tpu_custom_call.1
= control target key start
LH: loop header
LB: loop body
LE: loop exit
PB: predicated region body
PF: predicated region fallthrough
CT: control target
= control target key end

     0   :  { %s2154_s0 = inlined_call_operand.hbm [shape: f32[2,8,32], index: 0, kind: input, shape index: {}]   ;;  %s2155_s1 = inlined_call_operand.hbm [shape: f32[2,16,32], index: 1, kind: input, shape index: {}]   ;;  %s2156_s2 = inlined_call_operand.hbm [shape: f32[2,16,32], index: 2, kind: input, shape index: {}]   ;;  %s2157_s3 = inlined_call_operand.hbm [shape: bf16[32,32], index: 3, kind: input, shape index: {}]   ;;  %s2158_s4 = inlined_call_operand.hbm [shape: bf16[32,32], index: 4, kind: input, shape index: {}]   ;;  %s2159_s5 = inlined_call_operand.hbm [shape: bf16[32,32], index: 5, kind: input, shape index: {}]   ;;  %s2160_s6 = inlined_call_operand.vmem [shape: f32[1,32], index: 6, kind: input, shape index: {}]   ;;  %s2161_s7 = inlined_call_operand.vmem [shape: f32[1,32], index: 7, kind: input, shape index: {}]   ;;  %s2162_s8 = inlined_call_operand.hbm [shape: f32[2,8,32], index: 8, kind: output, shape index: {0}]   ;;  %s2163_s9 = inlined_call_operand.hbm [shape: bf16[2,8,32], index: 9, kind: output, shape index: {1}]   ;;  %s2164_s10 = inlined_call_operand.hbm [shape: bf16[2,16,32], index: 10, kind: output, shape index: {2}]   ;;  %s2165_s11 = inlined_call_operand.hbm [shape: bf16[2,16,32], index: 11, kind: output, shape index: {3}]  }
   0x1   :  { %2191 = sst [smem:[#allocation32_spill]] %s2155_s1 }
   0x2   :  { %2192 = sst [smem:[#allocation33_spill]] %s2157_s3 }
   0x3   :  { %2193 = sst [smem:[#allocation34_spill]] %s2161_s7 }
   0x4   :  { %2194 = sst [smem:[#allocation35_spill]] %s2162_s8 }
   0x5   :  { %2195 = sst [smem:[#allocation36_spill]] %s2163_s9 }
   0x6   :  { %2196 = sst [smem:[#allocation37_spill]] %s2164_s10 }
   0x7   :  { %2197 = sst [smem:[#allocation38_spill]] %s2165_s11 }
   0x8   :  { %17 = vsyncpa [#allocation3], 0 }
   0x9   :  { %19 = vsyncpa [#allocation3 + $0x1], 0 }
   0xa   :  { %20 = vsyncpa [#allocation6], 0 }
   0xb   :  { %22 = vsyncpa [#allocation6 + $0x1], 0 }
   0xc   :  { %23 = vsyncpa [#allocation9], 0 }
   0xd   :  { %24 = vsyncpa [#allocation12], 0 }
   0xe   :  { %25 = vsyncpa [#allocation4], 0 }
   0xf   :  { %27 = vsyncpa [#allocation4 + $0x1], 0 }
  0x10   :  { %28 = vsyncpa [#allocation15], 0 }
  0x11   :  { %30 = vsyncpa [#allocation15 + $0x1], 0 }
  0x12   :  { %31 = vsyncpa [#allocation18], 0 }
  0x13   :  { %33 = vsyncpa [#allocation18 + $0x1], 0  ;;  %s1718_s17 = smov 0   ;;  %s1720_s18 = smov 0  }
  0x14   :  { %s1722_s19 = smov 0   ;;  %s1724_s20 = smov 0  }
  0x15 LB: > { %2198 = sst [smem:[#allocation26_spill]] %s1626_s17  ;;  %s1739_s21 = sadd.s32 4294967295, %s1638_s20   ;;  %s1638_s20 = sphi %s1724_s20, %s2240_s20   ;;  %s1634_s19 = sphi %s1722_s19, %s2242_s19   ;;  %s1630_s18 = sphi %s1720_s18, %s2244_s18   ;;  %s1626_s17 = sphi %s1718_s17, %s2243_s17  }
  0x16   : > { %2199 = sst [smem:[#allocation27_spill]] %s1634_s19  ;;  %s2168_s22 = sadd.s32 4294967294, %s1638_s20  }
  0x17   : > { %s1743_s23 = sadd.s32 1, %s1638_s20   ;;  %s46_s24 = sadd.s32 1, %s1634_s19 }
  0x18   : > { %2200 = sst [smem:[#allocation28_spill]] %s1743_s23  ;;  %s43_s25 = ssub.s32 %s1638_s20, %s1743_s23 }
  0x19   : > { %p53_p0 = scmp.ne.s32.totalorder %s1634_s19, %s1630_s18  ;;  %p44_p1 = scmp.eq.s32.totalorder %s43_s25, 0 }
  0x1a   : > { %p54_p2 = scmp.eq.s32.totalorder %s1638_s20, 0  ;;  %p59_p3 = scmp.ne.s32.totalorder %s1630_s18, %s1626_s17 }
  0x1b   : > { %p2166_p4 = scmp.eq.s32.totalorder %s1739_s21, 0  ;;  %p240_p7 = scmp.eq.s32.totalorder %s1739_s21, 1 }
  0x1c   : > { %s1755_s26 = scalar_select %p44_p1, %s1634_s19, %s46_s24  }
  0x1d   : > { %p1757_p5 = por %p54_p2, %p53_p0  ;;  %p1763_p6 = por %p2166_p4, %p59_p3 }
  0x1e   : > { %2201 = sst [smem:[#allocation29_spill]] %s1755_s26  ;;  %p246_p8 = scmp.eq.s32.totalorder %s2168_s22, 1 }
  0x1f   : > { %s2203_s28 = scalar_select %p1763_p6, 1, 0 }
  0x20   : > { %p1104_p9 = scmp.ge.s32.totalorder %s1638_s20, 1  ;;  %p331_p10 = scmp.lt.s32.totalorder %s1638_s20, 3 }
  0x21   : > { %p1772_p11 = por %p240_p7, %p53_p0  ;;  %p1776_p12 = por %p246_p8, %p59_p3 }
  0x22   : > { %p1780_p13 = pnand %p1104_p9, %p331_p10  ;;  %s1640_s13 = smov [#allocation8]  }
  0x23   : > { %s2204_s29 = scalar_select %p1772_p11, 1, 0 }
  0x24   : > { %s2206_s30 = scalar_select %p1776_p12, 1, 0 }
  0x25   : > { %2205 = sst [smem:[#allocation30_spill]] %s2204_s29  ;;  %p1222_p1 = pneg %p1780_p13 }
  0x26   : > { %2207 = sst [smem:[#allocation31_spill]] %s2206_s30  ;;  %s343_s14 = sshll.u32 %s1640_s13, 4  ;;  %s344_s14 = int_to_ptr.vmem [resolvable:$true] %s343_s14 }
  0x27   : > { %s2208_s12 = scalar_select %p1780_p13, 1, 0 }
  0x28   : > { %p1788_p2 = pnand %p1222_p1, %p2166_p4  ;;  %p1258_p3 = scmp.lt.s32.totalorder %s1638_s20, 2 }
  0x29   : > { %s1795_s16 = sand.u32 1, %s1634_s19   ;;  %s407_s24 = sand.u32 1, %s1638_s20  }
  0x2a   : > { %s2209_s15 = scalar_select %p1788_p2, 1, 0 }
  0x2b   : > { %p2182_p7 = pneg %p1788_p2  ;;  %s1325_s25 = scalar_lea.vmem %s344_s14, 256 }
  0x2c   : > { %p1326_p8 = scmp.ne.s32.totalorder %s344_s14, %s1325_s25  ;;  %p1333_p12 = scmp.lt.s32.totalorder %s344_s14, %s344_s14 }
  0x2d   : > { %p1334_p1 = scmp.lt.s32.totalorder %s1325_s25, %s1325_s25 }
  0x2e   : > { %p1328_p9 = pnand %p1326_p8, %p2182_p7 }
  0x2f   : > { %p1335_p4 = por %p1334_p1, %p1333_p12 }
  0x30   : > { %p1329_p10 = pneg %p1328_p9 }
  0x32   : > { %p1336_p11 = pnand %p1335_p4, %p1329_p10 }
  0x34   : > { %1339 = shalt.err (!%p1336_p11)
}
  0x35   : > { %s2176_s13 = smov 64   ;;  %s2178_s22 = smov 4  }
  0x36   : > { %s2210_s3 = sld [smem:[#allocation33_spill]]  ;;  %p1815_p4 = pnand %p1258_p3, %p1757_p5 }
  0x37   : > { %s2180_s23 = sshll.u32 %s1795_s16, 4  ;;  %s2181_s30 = sshll.u32 %s1638_s20, 8 }
  0x38   : > { %s2212_s1 = sld [smem:[#allocation32_spill]]  ;;  %s411_s19 = scalar_lea.vmem [#allocation5], %s2180_s23 }
  0x39   : > { %s418_s26 = sshll.u32 %s411_s19, 4  ;;  %s1832_s27 = scalar_lea.sflag [#allocation6], %s407_s24  ;;  %s1830_s26 = int_to_ptr.vmem [resolvable:$true] %s418_s26 }
  0x3a   : > { %p1838_p11 = pneg %p1815_p4 }
  0x3c   : > { %1225 = dma.hbm_to_vmem [thread:$0]  (!%p1788_p2), %s2210_s3, 256, %s344_s14, [#allocation9], %s2176_s13, %s2176_s13, %s2178_s22  }
  0x3e   : > { %s1826_s10 = scalar_lea.hbm %s2212_s1, %s2181_s30  ;;  %s1345_s22 = scalar_lea.hbm %s2212_s1, 512 }
  0x3f   : > { %s1340_s14 = scalar_lea.hbm %s1826_s10, 256  ;;  %p1346_p8 = scmp.lt.s32.totalorder %s1826_s10, %s2212_s1 }
  0x40   : > { %p1341_p5 = scmp.ne.s32.totalorder %s1826_s10, %s1340_s14  ;;  %p1347_p9 = scmp.lt.s32.totalorder %s1345_s22, %s1340_s14 }
  0x42   : > { %p1343_p12 = pnand %p1838_p11, %p1341_p5  ;;  %p1348_p10 = por %p1347_p9, %p1346_p8 }
  0x44   : > { %p1344_p3 = pneg %p1343_p12 }
  0x46   : > { %p1349_p1 = pnand %p1348_p10, %p1344_p3 }
  0x48   : > { %1352 = shalt.err (!%p1349_p1)
}
  0x49   : > { %s1353_s24 = scalar_lea.vmem %s1830_s26, 256  ;;  %s1643_s30 = smov [#allocation5]  }
  0x4a   : > { %p1354_p0 = scmp.ne.s32.totalorder %s1830_s26, %s1353_s24  ;;  %s1358_s11 = sshll.u32 %s1643_s30, 4  ;;  %s1359_s11 = int_to_ptr.vmem [resolvable:$false] %s1358_s11 }
  0x4b   : > { %s1360_s17 = scalar_lea.vmem %s1359_s11, 512  ;;  %p1361_p7 = scmp.lt.s32.totalorder %s1830_s26, %s1359_s11 }
  0x4c   : > { %p1356_p5 = pnand %p1354_p0, %p1838_p11  ;;  %p1362_p6 = scmp.lt.s32.totalorder %s1360_s17, %s1353_s24 }
  0x4e   : > { %p1357_p12 = pneg %p1356_p5  ;;  %p1363_p13 = por %p1362_p6, %p1361_p7 }
  0x50   : > { %p1364_p2 = pnand %p1363_p13, %p1357_p12 }
  0x52   : > { %1367 = shalt.err (!%p1364_p2)
}
  0x53   : > { %s1644_s22 = smov 128   ;;  %s1645_s23 = smov 8  }
  0x54   : > { %1238 = dma.hbm_to_vmem [thread:$0]  (!%p1815_p4), %s1826_s10, 256, %s1830_s26, %s1832_s27, %s1644_s22, %s1644_s22, %s1645_s23  }
  0x55   : > { %s2214_s30 = sshll.u32 %s1638_s20, 8  ;;  %s2215_s11 = sshll.u32 %s1795_s16, 4 }
  0x56   : > { %s1869_s24 = scalar_lea.hbm %s2156_s2, %s2214_s30  ;;  %s1873_s17 = scalar_lea.vmem [#allocation7], %s2215_s11 }
  0x57   : > { %s439_s1 = sshll.u32 %s1873_s17, 4  ;;  %s1646_s3 = smov [#allocation10]   ;;  %s1907_s1 = int_to_ptr.vmem [resolvable:$true] %s439_s1 }
  0x58   : > { %s356_s9 = sshll.u32 %s1646_s3, 4  ;;  %s1647_s8 = smov [#allocation11]   ;;  %s357_s9 = int_to_ptr.vmem [resolvable:$true] %s356_s9 }
  0x59   : > { %s369_s29 = sshll.u32 %s1647_s8, 4  ;;  %s1379_s7 = scalar_lea.vmem %s357_s9, 256  ;;  %s370_s29 = int_to_ptr.vmem [resolvable:$true] %s369_s29 }
  0x5a   : > { %p1380_p6 = scmp.ne.s32.totalorder %s357_s9, %s1379_s7  ;;  %p2216_p13 = scmp.ne.s32.totalorder %s2209_s15, 0 }
  0x5b   : > { %p1387_p3 = scmp.lt.s32.totalorder %s357_s9, %s357_s9  ;;  %p1388_p8 = scmp.lt.s32.totalorder %s1379_s7, %s1379_s7 }
  0x5c   : > { %p2217_p2 = pneg %p2216_p13 }
  0x5d   : > { %p1389_p9 = por %p1388_p8, %p1387_p3 }
  0x5e   : > { %p1382_p0 = pnand %p1380_p6, %p2217_p2 }
  0x60   : > { %p1383_p7 = pneg %p1382_p0 }
  0x62   : > { %p1390_p10 = pnand %p1389_p9, %p1383_p7 }
  0x64   : > { %1393 = shalt.err (!%p1390_p10)
}
  0x65   : > { %s2218_s10 = smov 4   ;;  %s2219_s26 = smov 64  }
  0x66   : > { %1228 = dma.hbm_to_vmem [thread:$0]  (!%p2216_p13), %s2158_s4, 256, %s357_s9, [#allocation9], %s2219_s26, %s2219_s26, %s2218_s10  }
  0x67   : > { %s1405_s8 = scalar_lea.vmem %s370_s29, 256  ;;  %p2220_p5 = pmov %p2217_p2 }
  0x68   : > { %p1406_p1 = scmp.ne.s32.totalorder %s370_s29, %s1405_s8  ;;  %p1413_p2 = scmp.lt.s32.totalorder %s370_s29, %s370_s29 }
  0x69   : > { %p1414_p0 = scmp.lt.s32.totalorder %s1405_s8, %s1405_s8 }
  0x6a   : > { %p1408_p12 = pnand %p1406_p1, %p2220_p5 }
  0x6b   : > { %p1415_p7 = por %p1414_p0, %p1413_p2 }
  0x6c   : > { %p1409_p6 = pneg %p1408_p12 }
  0x6e   : > { %p1416_p3 = pnand %p1415_p7, %p1409_p6 }
  0x70   : > { %1419 = shalt.err (!%p1416_p3)
}
  0x71   : > { %1231 = dma.hbm_to_vmem [thread:$0]  (!%p2216_p13), %s2159_s5, 256, %s370_s29, [#allocation12], %s2219_s26, %s2219_s26, %s2218_s10  }
  0x72   : > { %s1109_s9 = sshll.u32 %s1795_s16, 3  ;;  %s1110_s19 = sshll.u32 %s1638_s20, 7 }
  0x73   : > { %s1903_s30 = scalar_lea.hbm %s2154_s0, %s1110_s19  ;;  %s393_s15 = scalar_lea.vmem [#allocation2], %s1109_s9 }
  0x74   : > { %s400_s8 = sshll.u32 %s393_s15, 4  ;;  %s390_s7 = scalar_lea.sflag [#allocation3], %s1795_s16  ;;  %s401_s8 = int_to_ptr.vmem [resolvable:$true] %s400_s8 }
  0x75   : > { %s1420_s14 = scalar_lea.hbm %s1903_s30, 128  ;;  %s1425_s26 = scalar_lea.hbm %s2154_s0, 256 }
  0x76   : > { %p1421_p8 = scmp.ne.s32.totalorder %s1903_s30, %s1420_s14  ;;  %p1426_p10 = scmp.lt.s32.totalorder %s1903_s30, %s2154_s0 }
  0x77   : > { %p1427_p1 = scmp.lt.s32.totalorder %s1425_s26, %s1420_s14 }
  0x78   : > { %p1423_p13 = pnand %p1421_p8, %p1838_p11 }
  0x79   : > { %p1428_p5 = por %p1427_p1, %p1426_p10 }
  0x7a   : > { %p1424_p9 = pneg %p1423_p13 }
  0x7c   : > { %p1429_p12 = pnand %p1428_p5, %p1424_p9 }
  0x7e   : > { %1432 = shalt.err (!%p1429_p12)
}
  0x7f   : > { %s1433_s9 = scalar_lea.vmem %s401_s8, 128  ;;  %s1648_s16 = smov [#allocation2]  }
  0x80   : > { %p1434_p6 = scmp.ne.s32.totalorder %s401_s8, %s1433_s9  ;;  %s1438_s11 = sshll.u32 %s1648_s16, 4  ;;  %s1439_s11 = int_to_ptr.vmem [resolvable:$false] %s1438_s11 }
  0x81   : > { %s1440_s3 = scalar_lea.vmem %s1439_s11, 256  ;;  %p1441_p7 = scmp.lt.s32.totalorder %s401_s8, %s1439_s11 }
  0x82   : > { %p1436_p2 = pnand %p1434_p6, %p1838_p11  ;;  %p1442_p3 = scmp.lt.s32.totalorder %s1440_s3, %s1433_s9 }
  0x84   : > { %p1437_p0 = pneg %p1436_p2  ;;  %p1443_p8 = por %p1442_p3, %p1441_p7 }
  0x86   : > { %p1444_p13 = pnand %p1443_p8, %p1437_p0 }
  0x88   : > { %1447 = shalt.err (!%p1444_p13)
}
  0x89   : > { %1235 = dma.hbm_to_vmem [thread:$0]  (!%p1815_p4), %s1903_s30, 128, %s401_s8, %s390_s7  }
  0x8a   : > { %s1448_s15 = scalar_lea.hbm %s1869_s24, 256  ;;  %s1453_s10 = scalar_lea.hbm %s2156_s2, 512 }
  0x8b   : > { %p1449_p9 = scmp.ne.s32.totalorder %s1869_s24, %s1448_s15  ;;  %p1454_p5 = scmp.lt.s32.totalorder %s1869_s24, %s2156_s2 }
  0x8c   : > { %p1455_p12 = scmp.lt.s32.totalorder %s1453_s10, %s1448_s15 }
  0x8d   : > { %p1451_p10 = pnand %p1449_p9, %p1838_p11 }
  0x8e   : > { %p1456_p6 = por %p1455_p12, %p1454_p5 }
  0x8f   : > { %p1452_p1 = pneg %p1451_p10 }
  0x91   : > { %p1457_p2 = pnand %p1456_p6, %p1452_p1 }
  0x93   : > { %1460 = shalt.err (!%p1457_p2)
}
  0x94   : > { %s1461_s30 = scalar_lea.vmem %s1907_s1, 256  ;;  %s1649_s8 = smov [#allocation7]  }
  0x95   : > { %p1462_p0 = scmp.ne.s32.totalorder %s1907_s1, %s1461_s30  ;;  %s1466_s7 = sshll.u32 %s1649_s8, 4  ;;  %s1467_s7 = int_to_ptr.vmem [resolvable:$false] %s1466_s7 }
  0x96   : > { %s1468_s17 = scalar_lea.vmem %s1467_s7, 512  ;;  %p1469_p8 = scmp.lt.s32.totalorder %s1907_s1, %s1467_s7 }
  0x97   : > { %p1464_p7 = pnand %p1462_p0, %p1838_p11  ;;  %p1470_p13 = scmp.lt.s32.totalorder %s1468_s17, %s1461_s30 }
  0x99   : > { %p1465_p3 = pneg %p1464_p7  ;;  %p1471_p9 = por %p1470_p13, %p1469_p8 }
  0x9b   : > { %p1472_p10 = pnand %p1471_p9, %p1465_p3 }
  0x9d   : > { %1475 = shalt.err (!%p1472_p10)
}
  0x9e   : > { %1241 = dma.hbm_to_vmem [thread:$0]  (!%p1815_p4), %s1869_s24, 256, %s1907_s1, %s1832_s27, %s1644_s22, %s1644_s22, %s1645_s23  }
  0x9f   : > { %p2221_p11 = scmp.ne.s32.totalorder %s2208_s12, 0 }
  0xa0   : > { %s1953_s13 = sand.u32 (!%p2221_p11), 1, %s1630_s18   ;;  %p2222_p1 = scmp.ne.s32.totalorder (!%p2221_p11), %s2203_s28, 0 }
  0xa1   : > { %451 = sbr.rel (%p2221_p11) target bundleno = 741 (0x2e5), region = 52  ;;  %s1956_s9 = sshll.u32 (!%p2221_p11), %s1953_s13, 3 }
  0xa2   : > { %s454_s25 = scalar_lea.sflag (!%p2221_p11), [#allocation3], %s1953_s13  ;;  %s457_s16 = scalar_lea.vmem (!%p2221_p11), [#allocation2], %s1956_s9 }
  0xa6   : > { %1597 = dma.done.wait (%p2222_p1), %s454_s25, 128  }
  0xa7   : > { %1599 = vsyncadd (%p2222_p1), %s454_s25, 4294967168  ;;  %s462_s1 = sand.u32 1, %s1739_s21   ;;  %s1119_s12 = sshll.u32 %s1953_s13, 4 }
  0xa8   : > { %s463_s27 = scalar_lea.sflag [#allocation6], %s462_s1  ;;  %s1968_s22 = scalar_lea.vmem [#allocation5], %s1119_s12 }
  0xa9   : > { %1601 = dma.done.wait (%p2222_p1), %s463_s27, 512  }
  0xaa   : > { %1603 = vsyncadd (%p2222_p1), %s463_s27, 4294966784  ;;  %s1974_s23 = scalar_lea.vmem [#allocation7], %s1119_s12  ;;  %p2223_p4 = scmp.eq.s32.totalorder %s1739_s21, 0 }
  0xac   : > { %1605 = dma.done.wait (%p2223_p4), [#allocation9], 512   ;;  %p2224_p5 = pmov %p2223_p4 }
  0xad   : > { %p2225_p12 = pmov %p2223_p4 }
  0xae   : > { %1607 = vsyncadd (%p2224_p5), [#allocation9], 4294966784 }
  0xaf   : > { %1609 = dma.done.wait (%p2225_p12), [#allocation12], 256   ;;  %p2226_p6 = pmov %p2223_p4 }
  0xb0   : > { %vm553_vm0 = vcmask 261120   ;;  %v552_v0 = vld [vmem:[%s457_s16] sm:$0xff]  ;;  %v1306_v7 = vld [vmem:[#allocation8 + $0x8] sm:$0xff]   ;;  %v1650_v9 = vmov 0.0   ;;  %v1308_v10 = vld [vmem:[#allocation8] sm:$0xff]   ;;  %vm1651_vm1 = vmmov 0  }
  0xb1   : > { %1611 = vsyncadd (%p2226_p6), [#allocation12], 4294967040  ;;  %v554_v1 = vsel %vm553_vm0, %v552_v0, 0.0  ;;  %v1307_v8 = vld [vmem:[#allocation10 + $0x8] sm:$0xff]   ;;  %1172 = vmatprep.subr.bf16.mxu0 %v1650_v9  ;;  %1180 = vmatprep.subr.bf16.mxu1 %v1650_v9  ;;  %v1309_v11 = vld [vmem:[#allocation10] sm:$0xff]   ;;  %s2227_s15 = sld [smem:[#allocation34_spill]] }
  0xb2   : > { %555 = vadd.xlane.f32.xlu0 %v554_v1  ;;  %1173 = vmatpush3.bf16.msra.mxu0 %v1306_v7  ;;  %v648_v12 = vld [vmem:[%s1968_s22] sm:$0xff]  ;;  %v649_v13 = vld [vmem:[%s1968_s22 + $0x8] sm:$0xff]  ;;  %s529_s14 = scalar_lea.vmem [#allocation13], %s1956_s9  ;;  %s2228_s29 = sld [smem:[#allocation30_spill]]  ;;  %vm646_vm2 = vcmask 257024  }
  0xb3   : > { %1181 = vmatpush3.bf16.msra.mxu1 %v1307_v8  ;;  %1174 = vmatprep.subr.bf16.mxu0 %v1650_v9  ;;  %v650_v14 = vpack.c.bf16 %v649_v13, %v648_v12  ;;  %v1128_v19 = vld [vmem:[%s2160_s6] ss:$0 sm:$0xff]  ;;  %v1310_v24 = vld [vmem:[#allocation11 + $0x8] sm:$0xff]   ;;  %v1311_v26 = vld [vmem:[#allocation11] sm:$0xff]   ;;  %s2005_s10 = scalar_lea.vmem [#allocation16], %s1956_s9  ;;  %s2012_s26 = sshll.u32 %s1739_s21, 7 }
  0xb4   : > { %1182 = vmatprep.subr.bf16.mxu1 %v1650_v9  ;;  %1176 = vmatprep.mubr.msk.bf16.mxu0 %vm1651_vm1, %v1650_v9  ;;  %v721_v27 = vld [vmem:[%s1974_s23] sm:$0xff]  ;;  %v722_v28 = vld [vmem:[%s1974_s23 + $0x8] sm:$0xff]  ;;  %s823_s19 = sshll.u32 %s529_s14, 4  ;;  %s2229_s7 = sld [smem:[#allocation35_spill]]  ;;  %s824_s19 = int_to_ptr.vmem [resolvable:$true] %s823_s19 }
  0xb5   : > { %1184 = vmatprep.mubr.msk.bf16.mxu1 %vm1651_vm1, %v1650_v9  ;;  %v723_v29 = vpack.c.bf16 %v722_v28, %v721_v27  ;;  %s795_s25 = scalar_lea.sflag [#allocation4], %s1953_s13  ;;  %s1476_s16 = scalar_lea.vmem %s824_s19, 128 }
  0xb6   : > { %1175 = vmatpush3.bf16.msra.mxu0 %v1308_v10  ;;  %p1477_p2 = scmp.ne.s32.totalorder %s824_s19, %s1476_s16  ;;  %s1652_s12 = smov [#allocation13]  }
  0xb7   : > { %1183 = vmatpush3.bf16.msra.mxu1 %v1309_v11  ;;  %1188 = vmatprep.subr.bf16.mxu0 %v1650_v9  ;;  %v1129_v21 = vld [vmem:[%s2227_s15] ss:$0 sm:$0xff]  ;;  %s1480_s27 = sshll.u32 %s1652_s12, 4  ;;  %s1481_s27 = int_to_ptr.vmem [resolvable:$false] %s1480_s27 }
  0xb8   : > { %p2230_p0 = scmp.ne.s32.totalorder %s2228_s29, 0  ;;  %s1482_s22 = scalar_lea.vmem %s1481_s27, 256 }
  0xb9   : > { %p1483_p8 = scmp.lt.s32.totalorder %s824_s19, %s1481_s27  ;;  %p1484_p13 = scmp.lt.s32.totalorder %s1482_s22, %s1476_s16 }
  0xba   : > { %1185 = vmatmul.mubr.msk.bf16.vlgmr.msra.gmra.mxu1 %vm553_vm0, %v650_v14  ;;  %s821_s17 = scalar_lea.hbm %s2229_s7, %s2012_s26  ;;  %p1478_p7 = pnand %p1477_p2, %p2230_p0 }
  0xbb   : > { %p1485_p9 = por %p1484_p13, %p1483_p8 }
  0xbc   : > { %p1479_p3 = pneg %p1478_p7 }
  0xbe   : > { %p1486_p10 = pnand %p1485_p9, %p1479_p3 }
 0x13b   : > { %v556_v2 = vpop.xlane.xlu0 %555 }
 0x13c   : > { %v558_v3 = vmul.f32 0.03125, %v556_v2 }
 0x13e   : > { %v559_v4 = vsub.f32 %v552_v0, %v558_v3 }
 0x140   : > { %v560_v5 = vmul.f32 %v559_v4, %v559_v4 }
 0x142   : > { %v561_v6 = vsel %vm553_vm0, %v560_v5, 0.0 }
 0x143   : > { %562 = vadd.xlane.f32.xlu0 %v561_v6 }
 0x17a   : > { %v704_v30 = vpop.f32.mrf.mxu1 }
 0x17b   : > { %v1157_v31 = vpack.c.bf16 %v704_v30, %v704_v30 }
 0x17c   : > { %v1186_v32 = vpop.f32.mrf.mxu1 }
 0x17d   : > { %719 = vst.msk [vmem:[%s2005_s10] sm:$0xf] %vm646_vm2, %v1157_v31 }
 0x17e   : > { %v707_v33 = vpop.f32.mrf.mxu1 }
 0x17f   : > { %v1158_v34 = vpack.c.bf16 %v707_v33, %v707_v33 }
 0x180   : > { %v1187_v35 = vpop.f32.mrf.mxu1 }
 0x181   : > { %720 = vst.msk [vmem:[%s2005_s10 + $0x4] sm:$0xf] %vm646_vm2, %v1158_v34 }
 0x1cc   : > { %v563_v15 = vpop.xlane.xlu0 %562 }
 0x1cd   : > { %v564_v16 = vmul.f32 0.03125, %v563_v15 }
 0x1cf   : > { %v565_v17 = vadd.f32 1e-05, %v564_v16 }
 0x1d1   : > { %1312 = vrsqrt.f32 %v565_v17 }
 0x1de   : > { %v1313_v18 = vpop.eup %1312 }
 0x1df   : > { %v567_v20 = vmul.f32 %v1313_v18, %v559_v4 }
 0x1e1   : > { %v575_v22 = vmul.f32 %v1128_v19, %v567_v20 }
 0x1e3   : > { %v583_v23 = vadd.f32 %v1129_v21, %v575_v22 }
 0x1e5   : > { %v585_v25 = vpack.c.bf16 %v583_v23, %v583_v23  ;;  %584 = vst.msk [vmem:[%s529_s14] sm:$0xff] %vm553_vm0, %v583_v23 }
 0x1e7   : > { %1177 = vmatmul.mubr.msk.bf16.vlgmr.msra.gmra.mxu0 %vm553_vm0, %v585_v25 }
 0x1e8   : > { %1189 = vmatpush3.bf16.msra.mxu0 %v1310_v24  ;;  %1192 = vmatprep.mubr.msk.bf16.mxu0 %vm1651_vm1, %v1650_v9 }
 0x1e9   : > { %1190 = vmatprep.subr.bf16.mxu0 %v1650_v9 }
 0x1ec   : > { %1191 = vmatpush3.bf16.msra.mxu0 %v1311_v26 }
 0x1ef   : > { %1193 = vmatmul.mubr.msk.bf16.vlgmr.msra.gmra.mxu0 %vm553_vm0, %v723_v29 }
 0x1f0   : > { %1489 = shalt.err (!%p1486_p10)
}
 0x1f1   : > { %s1490_s23 = scalar_lea.hbm %s821_s17, 128  ;;  %s1494_s11 = scalar_lea.hbm %s2229_s7, 256 }
 0x1f2   : > { %p1491_p11 = scmp.ne.s32.totalorder %s821_s17, %s1490_s23  ;;  %p1495_p5 = scmp.lt.s32.totalorder %s821_s17, %s2229_s7 }
 0x1f3   : > { %p1496_p12 = scmp.lt.s32.totalorder %s1494_s11, %s1490_s23 }
 0x1f4   : > { %p1492_p1 = pnand %p1491_p11, %p2230_p0 }
 0x1f5   : > { %p1497_p6 = por %p1496_p12, %p1495_p5 }
 0x1f6   : > { %p1493_p4 = pneg %p1492_p1 }
 0x1f8   : > { %p1498_p2 = pnand %p1497_p6, %p1493_p4 }
 0x1fa   : > { %1501 = shalt.err (!%p1498_p2)
}
 0x1fb   : > { %1214 = dma.vmem_to_hbm [thread:$0]  (%p2230_p0), %s824_s19, 128, %s821_s17, %s795_s25  }
 0x1fc   : > { %s1125_s14 = sshll.u32 %s1953_s13, 2  ;;  %s849_s30 = sshll.u32 %s2005_s10, 4  ;;  %s2034_s30 = int_to_ptr.vmem [resolvable:$true] %s849_s30 }
 0x1fd   : > { %s1148_s8 = sshll.u32 %s1739_s21, 6  ;;  %s536_s16 = scalar_lea.vmem [#allocation14], %s1125_s14 }
 0x1fe   : > { %s836_s12 = sshll.u32 %s536_s16, 4  ;;  %s2231_s23 = sld [smem:[#allocation36_spill]]  ;;  %s2041_s12 = int_to_ptr.vmem [resolvable:$true] %s836_s12 }
 0x1ff   : > { %s2232_s19 = sld [smem:[#allocation37_spill]]  ;;  %s2052_s17 = scalar_lea.sflag [#allocation15], %s462_s1 }
 0x200   : > { %s1502_s3 = scalar_lea.vmem %s2041_s12, 64  ;;  %s1653_s15 = smov [#allocation14]  }
 0x201   : > { %p1503_p7 = scmp.ne.s32.totalorder %s2041_s12, %s1502_s3  ;;  %s1506_s14 = sshll.u32 %s1653_s15, 4  ;;  %s1507_s14 = int_to_ptr.vmem [resolvable:$false] %s1506_s14 }
 0x202   : > { %p1509_p13 = scmp.lt.s32.totalorder %s2041_s12, %s1507_s14 }
 0x203   : > { %p1504_p3 = pnand %p1503_p7, %p2230_p0 }
 0x204   : > { %s2039_s28 = scalar_lea.hbm %s2231_s23, %s1148_s8  ;;  %s1508_s8 = scalar_lea.vmem %s1507_s14, 128 }
 0x205   : > { %s2233_s25 = smov %s2232_s19  ;;  %s2047_s10 = scalar_lea.hbm %s2232_s19, %s2012_s26 }
 0x206   : > { %p1505_p8 = pneg %p1504_p3  ;;  %p1510_p9 = scmp.lt.s32.totalorder %s1508_s8, %s1502_s3 }
 0x208   : > { %p1511_p10 = por %p1510_p9, %p1509_p13 }
 0x20a   : > { %p1512_p11 = pnand %p1511_p10, %p1505_p8 }
 0x2a7   : > { %v639_v36 = vpop.f32.mrf.mxu0 }
 0x2a8   : > { %v645_v37 = vpack.c.bf16 %v639_v36, %v639_v36 }
 0x2a9   : > { %v1178_v38 = vpop.f32.mrf.mxu0 }
 0x2aa   : > { %647 = vst.msk [vmem:[%s536_s16] sm:$0xf] %vm646_vm2, %v645_v37 }
 0x2ab   : > { %v642_v39 = vpop.f32.mrf.mxu0 }
 0x2ac   : > { %1515 = shalt.err (!%p1512_p11)
}
 0x2ad   : > { %s1516_s21 = scalar_lea.hbm %s2039_s28, 64  ;;  %s1520_s27 = scalar_lea.hbm %s2231_s23, 128 }
 0x2ae   : > { %p1517_p1 = scmp.ne.s32.totalorder %s2039_s28, %s1516_s21  ;;  %p1521_p12 = scmp.lt.s32.totalorder %s2039_s28, %s2231_s23 }
 0x2af   : > { %p1522_p6 = scmp.lt.s32.totalorder %s1520_s27, %s1516_s21 }
 0x2b0   : > { %p1518_p4 = pnand %p1517_p1, %p2230_p0 }
 0x2b1   : > { %p1523_p2 = por %p1522_p6, %p1521_p12 }
 0x2b2   : > { %p1519_p5 = pneg %p1518_p4 }
 0x2b4   : > { %p1524_p7 = pnand %p1523_p2, %p1519_p5 }
 0x2b6   : > { %1527 = shalt.err (!%p1524_p7)
}
 0x2b7   : > { %1215 = dma.vmem_to_hbm [thread:$0]  (%p2230_p0), %s2041_s12, 64, %s2039_s28, %s2052_s17  }
 0x2b8   : > { %s1528_s11 = scalar_lea.vmem %s2034_s30, 128  ;;  %s1654_s19 = smov [#allocation16]  }
 0x2b9   : > { %p1529_p3 = scmp.ne.s32.totalorder %s2034_s30, %s1528_s11  ;;  %s1532_s3 = sshll.u32 %s1654_s19, 4  ;;  %s1533_s3 = int_to_ptr.vmem [resolvable:$false] %s1532_s3 }
 0x2ba   : > { %s1534_s15 = scalar_lea.vmem %s1533_s3, 256  ;;  %p1535_p9 = scmp.lt.s32.totalorder %s2034_s30, %s1533_s3 }
 0x2bb   : > { %p1530_p8 = pnand %p1529_p3, %p2230_p0  ;;  %p1536_p10 = scmp.lt.s32.totalorder %s1534_s15, %s1528_s11 }
 0x2bd   : > { %p1531_p13 = pneg %p1530_p8  ;;  %p1537_p11 = por %p1536_p10, %p1535_p9 }
 0x2bf   : > { %p1538_p1 = pnand %p1537_p11, %p1531_p13 }
 0x2c1   : > { %1541 = shalt.err (!%p1538_p1)
}
 0x2c2   : > { %s1542_s14 = scalar_lea.hbm %s2047_s10, 128  ;;  %s1546_s8 = scalar_lea.hbm %s2233_s25, 256 }
 0x2c3   : > { %p1543_p4 = scmp.ne.s32.totalorder %s2047_s10, %s1542_s14  ;;  %p1547_p6 = scmp.lt.s32.totalorder %s2047_s10, %s2233_s25 }
 0x2c4   : > { %p1548_p2 = scmp.lt.s32.totalorder %s1546_s8, %s1542_s14 }
 0x2c5   : > { %p1544_p5 = pnand %p1543_p4, %p2230_p0 }
 0x2c6   : > { %p1549_p7 = por %p1548_p2, %p1547_p6 }
 0x2c7   : > { %p1545_p12 = pneg %p1544_p5 }
 0x2c9   : > { %p1550_p3 = pnand %p1549_p7, %p1545_p12 }
 0x2cb   : > { %1553 = shalt.err (!%p1550_p3)
}
 0x2cc   : > { %s1655_s16 = smov 64   ;;  %s1656_s27 = smov 4   ;;  %v1179_v40 = vpop.f32.mrf.mxu0 }
 0x2cd   : > { %1216 = dma.vmem_to_hbm [thread:$0]  (%p2230_p0), %s2034_s30, 128, %s2047_s10, %s2052_s17, %s1655_s16, %s1655_s16, %s1656_s27  }
 0x2ce   : > { %v777_v41 = vpop.f32.mrf.mxu0  ;;  %s550_s22 = scalar_lea.vmem [#allocation17], %s1956_s9  ;;  %s2234_s3 = sld [smem:[#allocation38_spill]] }
 0x2cf   : > { %v1159_v42 = vpack.c.bf16 %v777_v41, %v777_v41  ;;  %s865_s24 = sshll.u32 %s550_s22, 4  ;;  %s810_s9 = scalar_lea.sflag [#allocation18], %s1953_s13  ;;  %s2101_s24 = int_to_ptr.vmem [resolvable:$true] %s865_s24 }
 0x2d0   : > { %v1194_v43 = vpop.f32.mrf.mxu0  ;;  %s1554_s10 = scalar_lea.vmem %s2101_s24, 128  ;;  %s1657_s17 = smov [#allocation17]  }
 0x2d1   : > { %792 = vst.msk [vmem:[%s550_s22] sm:$0xf] %vm646_vm2, %v1159_v42  ;;  %p1555_p8 = scmp.ne.s32.totalorder %s2101_s24, %s1554_s10  ;;  %s1558_s15 = sshll.u32 %s1657_s17, 4  ;;  %s1559_s15 = int_to_ptr.vmem [resolvable:$false] %s1558_s15 }
 0x2d2   : > { %v780_v44 = vpop.f32.mrf.mxu0  ;;  %s1560_s14 = scalar_lea.vmem %s1559_s15, 256  ;;  %p1561_p10 = scmp.lt.s32.totalorder %s2101_s24, %s1559_s15 }
 0x2d3   : > { %v1160_v45 = vpack.c.bf16 %v780_v44, %v780_v44  ;;  %p1556_p13 = pnand %p1555_p8, %p2230_p0  ;;  %p1562_p11 = scmp.lt.s32.totalorder %s1560_s14, %s1554_s10 }
 0x2d4   : > { %s2107_s30 = scalar_lea.hbm %s2234_s3, %s2012_s26  ;;  %v1195_v46 = vpop.f32.mrf.mxu0 }
 0x2d5   : > { %793 = vst.msk [vmem:[%s550_s22 + $0x4] sm:$0xf] %vm646_vm2, %v1160_v45  ;;  %p1557_p9 = pneg %p1556_p13  ;;  %p1563_p1 = por %p1562_p11, %p1561_p10 }
 0x2d7   : > { %p1564_p4 = pnand %p1563_p1, %p1557_p9 }
 0x2d9   : > { %1567 = shalt.err (!%p1564_p4)
}
 0x2da   : > { %s1568_s26 = scalar_lea.hbm %s2107_s30, 128  ;;  %s1572_s28 = scalar_lea.hbm %s2234_s3, 256 }
 0x2db   : > { %p1569_p5 = scmp.ne.s32.totalorder %s2107_s30, %s1568_s26  ;;  %p1573_p2 = scmp.lt.s32.totalorder %s2107_s30, %s2234_s3 }
 0x2dc   : > { %p1574_p7 = scmp.lt.s32.totalorder %s1572_s28, %s1568_s26 }
 0x2dd   : > { %p1570_p12 = pnand %p1569_p5, %p2230_p0 }
 0x2de   : > { %p1575_p3 = por %p1574_p7, %p1573_p2 }
 0x2df   : > { %p1571_p6 = pneg %p1570_p12 }
 0x2e1   : > { %p1576_p8 = pnand %p1575_p3, %p1571_p6 }
 0x2e3   : > { %1579 = shalt.err (!%p1576_p8)
}
 0x2e4   : > { %1217 = dma.vmem_to_hbm [thread:$0]  (%p2230_p0), %s2101_s24, 128, %s2107_s30, %s810_s9, %s1655_s16, %s1655_s16, %s1656_s27  }
 0x2e5 PF: > { %s2235_s1 = sld [smem:[#allocation26_spill]]  ;;  %p2238_p9 = scmp.ge.s32.totalorder %s1638_s20, 2 }
 0x2e6   : > { %s2236_s22 = sld [smem:[#allocation31_spill]] }
 0x2eb   : > { %s880_s11 = sand.u32 1, %s2235_s1  }
 0x2ec   : > { %p2237_p13 = scmp.ne.s32.totalorder %s2236_s22, 0  ;;  %s881_s19 = scalar_lea.sflag [#allocation4], %s880_s11 }
 0x2ee   : > { %p1243_p10 = pnand %p2238_p9, %p2237_p13 }
 0x2f0   : > { %p1244_p11 = pneg %p1243_p10 }
 0x2f2   : > { %1613 = dma.done.wait (%p1244_p11), %s881_s19, 128  }
 0x2f3   : > { %1615 = vsyncadd (%p1244_p11), %s881_s19, 4294967168  ;;  %s2239_s29 = sadd.s32 4294967294, %s1638_s20  }
 0x2f4   : > { %s889_s10 = sand.u32 1, %s2239_s29  }
 0x2f5   : > { %s890_s17 = scalar_lea.sflag [#allocation15], %s889_s10 }
 0x2f6   : > { %1617 = dma.done.wait (%p1244_p11), %s890_s17, 192  }
 0x2f7   : > { %1619 = vsyncadd (%p1244_p11), %s890_s17, 4294967104  ;;  %s908_s15 = scalar_lea.sflag [#allocation18], %s880_s11 }
 0x2f8   : > { %1621 = dma.done.wait (%p1244_p11), %s908_s15, 128  }
 0x2f9   : > { %1623 = vsyncadd (%p1244_p11), %s908_s15, 4294967168  ;;  %s2240_s20 = sld [smem:[#allocation28_spill]]  ;;  %s2243_s17 = smov %s1630_s18 }
 0x2fa   : > { %s2241_s16 = sld [smem:[#allocation27_spill]] }
 0x2fb   : > { %s2242_s19 = sld [smem:[#allocation29_spill]] }
 0x2ff   : > { %p36_p0 = scmp.ge.s32.totalorder %s2240_s20, 4  }
 0x300   : > { %s2244_s18 = smov %s2241_s16 }
 0x301   :  { %38 = sbr.rel (!%p36_p0) target bundleno = 21 (0x15), region = 182 }
 0x306   :  { %913 = vsyncpa [#allocation3], 1 }
 0x307   :  { %915 = vsyncpa [#allocation3 + $0x1], 1 }
 0x308   :  { %916 = vsyncpa [#allocation6], 1 }
 0x309   :  { %918 = vsyncpa [#allocation6 + $0x1], 1 }
 0x30a   :  { %919 = vsyncpa [#allocation9], 1 }
 0x30b   :  { %920 = vsyncpa [#allocation12], 1 }
 0x30c   :  { %921 = vsyncpa [#allocation4], 1 }
 0x30d   :  { %923 = vsyncpa [#allocation4 + $0x1], 1 }
 0x30e   :  { %924 = vsyncpa [#allocation15], 1 }
 0x30f   :  { %926 = vsyncpa [#allocation15 + $0x1], 1 }
 0x310   :  { %927 = vsyncpa [#allocation18], 1 }
 0x311   :  { %929 = vsyncpa [#allocation18 + $0x1], 1 }

</bundles_post_ra>
